<compile_context>
chip_gen: v5e
topology: v5e:2x2
jax: 0.10.0
libtpu: 0.0.40
codegen_flags: <defaults>
</compile_context>

<pallas_src>
import jax
import jax.numpy as jnp
from jax.experimental import pallas as pl
from jax.experimental.pallas import tpu as pltpu


def bahdanau_kernel(q_ref, k_ref, wa_ref, ua_ref, b_ref, va_ref, ctx_ref, w_ref):
    # q_ref:  (TB, H)     query tile (compute dtype, lane-dense)
    # k_ref:  (TB, S, H)  keys tile (compute dtype)
    # wa_ref: (H, H)      Wa^T      ua_ref: (H, H)  Ua^T   (compute dtype)
    # b_ref:  (1, H)      fused bias (wa_b + ua_b), f32
    # va_ref: (1, H)      Va weight row, f32 (Va bias dropped: softmax-invariant)
    # ctx_ref:(TB, H)     w_ref: (TB, S)   lane-dense output slabs
    TB, S, H = k_ref.shape

    q = q_ref[...]                                                       # (TB, H)
    k = k_ref[...]                                                       # (TB, S, H)

    # Wa(query) + fused bias: MXU matmul with M = TB rows, f32 accumulation.
    q_proj = jnp.dot(q, wa_ref[...],
                     preferred_element_type=jnp.float32) + b_ref[...]    # (TB, H)

    # Ua(keys), bias-free: flatten batch*seq so the MXU sees M = TB*S rows.
    # Layout-free as long as S % 8 == 0 (true here, S = 8); keep H a multiple
    # of 128 in production to avoid any relayout copy.
    k_flat = k.reshape(TB * S, H)
    k_proj = jnp.dot(k_flat, ua_ref[...],
                     preferred_element_type=jnp.float32).reshape(TB, S, H)

    # tanh(Wa(q) + Ua(k)) in f32 (only the MXU inputs are low precision — safe
    # on v5e which has no bf16 VPU/EUP).
    t = jnp.tanh(q_proj.reshape(TB, 1, H) + k_proj)                      # (TB, S, H)

    # Va(.) as a lane-axis reduction: scores stay lane-dense as (TB, S), no
    # (S,1)->(1,S) transpose downstream.
    va = va_ref[...].reshape(1, 1, H)
    scores = jnp.sum(t * va, axis=-1)                                    # (TB, S)

    # Softmax along the lane (S) axis; EUP approximate reciprocal frees the VPU.
    m = jnp.max(scores, axis=-1, keepdims=True)                          # (TB, 1)
    e = jnp.exp(scores - m)                                              # (TB, S)
    denom = jnp.sum(e, axis=-1, keepdims=True)                           # (TB, 1)
    w = e * pl.reciprocal(denom, approx=True)                            # (TB, S)
    w_ref[...] = w.astype(w_ref.dtype)

    # context[b] = sum_s w[b,s] * keys[b,s,:]  — VPU broadcast-multiply +
    # S-axis reduce instead of TB degenerate M=1 MXU matmuls.
    ctx = jnp.sum(w[:, :, None] * k.astype(jnp.float32), axis=1)         # (TB, H)
    ctx_ref[...] = ctx.astype(ctx_ref.dtype)


_VMEM_BUDGET_BYTES = 40 * 1024 * 1024   # tile-sizing budget, safe on v7x (64 MiB physical)
_VMEM_LIMIT_BYTES = 48 * 1024 * 1024    # explicit scoped-VMEM limit for pallas_call


def _pick_batch_tile(B, S, H, key_itemsize, out_itemsize):
    """Largest batch tile that fits the VMEM budget, satisfies the sublane
    constraint (TB % 8 == 0 or TB == padded batch) and avoids a wrapper-side
    pad/copy of the keys whenever possible."""
    per_row = (2 * S * H * key_itemsize            # keys tile, double-buffered
               + 2 * S * H * 4                     # k_proj + tanh intermediates (f32)
               + 2 * (H + S) * out_itemsize        # ctx + weights slabs, double-buffered
               + 2 * H * key_itemsize)             # query tile, double-buffered
    fixed = 2 * 2 * H * H * key_itemsize + 4 * H * 4   # resident Wa^T/Ua^T + bias/Va rows
    cap = (_VMEM_BUDGET_BYTES - fixed) // max(per_row, 1)
    cap = int(max(8, min(256, cap)))               # MXU-friendly upper bound

    # Prefer the largest multiple-of-8 divisor of B (no padding; grid >= 2 when
    # possible so v7x can shard batch tiles across both TensorCores).
    best8 = 0
    d = 8
    while d <= min(B, cap):
        if B % d == 0:
            best8 = d
        d += 8
    if best8:
        return best8, B
    if B <= cap:
        return B, B                                # single full tile, no padding
    # TODO(synk): handle the ragged last tile in-kernel (row mask) instead of
    # padding the keys in HBM; this fallback is not hit at demo shapes.
    tb = cap - (cap % 8)
    bp = ((B + tb - 1) // tb) * tb
    return tb, bp


def bahdanau_attention(query, keys, wa_w, wa_b, ua_w, ua_b, va_w, va_b,
                       *, compute_dtype=None):
    """query: (B,1,H), keys: (B,S,H). nn.Linear weights are (out,in); Wa/Ua are
    pre-transposed in the wrapper. compute_dtype (e.g. jnp.bfloat16) controls
    the MXU-operand dtype of query/keys/Wa/Ua; accumulation, tanh, softmax and
    the context reduction stay in f32."""
    B, Lq, H = query.shape
    assert Lq == 1, "decoder query is expected to have a single time step"
    S = keys.shape[1]
    out_dtype = query.dtype
    cdt = out_dtype if compute_dtype is None else compute_dtype

    TB, Bp = _pick_batch_tile(B, S, H,
                              jnp.dtype(cdt).itemsize,
                              jnp.dtype(out_dtype).itemsize)

    q2 = query.reshape(B, H).astype(cdt)           # lane-dense 2-D query view
    keys_c = keys.astype(cdt)
    if Bp != B:                                    # rare fallback only (see _pick_batch_tile)
        pad = Bp - B
        q2 = jnp.pad(q2, ((0, pad), (0, 0)))
        keys_c = jnp.pad(keys_c, ((0, pad), (0, 0), (0, 0)))

    wa_t = wa_w.T.astype(cdt)                      # (H, H)
    ua_t = ua_w.T.astype(cdt)                      # (H, H)
    b_fused = (wa_b + ua_b).reshape(1, H).astype(jnp.float32)   # single pre-tanh bias
    va = va_w.reshape(1, H).astype(jnp.float32)    # Va weight row (Va bias dropped)

    grid = (Bp // TB,)

    # TODO(synk): for very large H (>= ~1024) add a K-reduction grid axis with a
    # VMEM accumulator instead of holding the full (H,H) weights resident, and
    # single-buffer the constant-index weight blocks.
    grid_spec = pltpu.PrefetchScalarGridSpec(
        num_scalar_prefetch=0,
        grid=grid,
        in_specs=[
            pl.BlockSpec((TB, H), lambda b: (b, 0)),        # query tile
            pl.BlockSpec((TB, S, H), lambda b: (b, 0, 0)),  # keys tile
            pl.BlockSpec((H, H), lambda b: (0, 0)),         # Wa^T (resident)
            pl.BlockSpec((H, H), lambda b: (0, 0)),         # Ua^T (resident)
            pl.BlockSpec((1, H), lambda b: (0, 0)),         # fused bias
            pl.BlockSpec((1, H), lambda b: (0, 0)),         # Va weight row
        ],
        out_specs=[
            pl.BlockSpec((TB, H), lambda b: (b, 0)),        # context slab
            pl.BlockSpec((TB, S), lambda b: (b, 0)),        # weights slab
        ],
    )

    ctx2, w2 = pl.pallas_call(
        bahdanau_kernel,
        out_shape=(
            jax.ShapeDtypeStruct((Bp, H), out_dtype),
            jax.ShapeDtypeStruct((Bp, S), out_dtype),
        ),
        grid_spec=grid_spec,
        compiler_params=pltpu.CompilerParams(
            dimension_semantics=("parallel",),
            vmem_limit_bytes=_VMEM_LIMIT_BYTES),
    )(q2, keys_c, wa_t, ua_t, b_fused, va)

    context = ctx2[:B].reshape(B, 1, H)
    weights = w2[:B].reshape(B, 1, S)
    return context, weights


def bahdanau_reference(query, keys, wa_w, wa_b, ua_w, ua_b, va_w, va_b):
    """Pure-JAX reference mirroring the PyTorch forward exactly."""
    q_proj = query @ wa_w.T + wa_b                        # (B,1,H)
    k_proj = keys @ ua_w.T + ua_b                         # (B,S,H)
    scores = jnp.tanh(q_proj + k_proj) @ va_w.T + va_b    # (B,S,1)
    scores = jnp.squeeze(scores, 2)[:, None, :]           # (B,1,S)
    weights = jax.nn.softmax(scores, axis=-1)
    context = jnp.einsum('bqs,bsh->bqh', weights, keys)
    return context, weights


if __name__ == "__main__":
    B, S, H = 2, 8, 32
    key = jax.random.PRNGKey(0)
    k_q, k_k, k_wa, k_ba, k_ua, k_bu, k_va, k_bv = jax.random.split(key, 8)

    query = jax.random.normal(k_q, (B, 1, H), dtype=jnp.float32)
    keys = jax.random.normal(k_k, (B, S, H), dtype=jnp.float32)

    # Deterministic parameter init (shapes follow nn.Linear: weight = (out, in)).
    scale = 1.0 / jnp.sqrt(H)
    wa_w = jax.random.uniform(k_wa, (H, H), minval=-scale, maxval=scale)
    wa_b = jax.random.uniform(k_ba, (H,), minval=-scale, maxval=scale)
    ua_w = jax.random.uniform(k_ua, (H, H), minval=-scale, maxval=scale)
    ua_b = jax.random.uniform(k_bu, (H,), minval=-scale, maxval=scale)
    va_w = jax.random.uniform(k_va, (1, H), minval=-scale, maxval=scale)
    va_b = jax.random.uniform(k_bv, (1,), minval=-scale, maxval=scale)

    ctx_ref, w_ref = bahdanau_reference(
        query, keys, wa_w, wa_b, ua_w, ua_b, va_w, va_b)

    # f32 compute path (tolerance absorbs the EUP approximate reciprocal).
    context, weights = bahdanau_attention(
        query, keys, wa_w, wa_b, ua_w, ua_b, va_w, va_b)
    jax.block_until_ready((context, weights))
    assert context.shape == (B, 1, H) and weights.shape == (B, 1, S)
    assert jnp.allclose(context, ctx_ref, atol=5e-3, rtol=5e-3)
    assert jnp.allclose(weights, w_ref, atol=5e-3, rtol=5e-3)

    # bf16 MXU-operand path (the bandwidth lever for v6e/v7x); f32 accumulation.
    ctx_bf, w_bf = bahdanau_attention(
        query, keys, wa_w, wa_b, ua_w, ua_b, va_w, va_b,
        compute_dtype=jnp.bfloat16)
    jax.block_until_ready((ctx_bf, w_bf))
    assert jnp.allclose(ctx_bf, ctx_ref, atol=3e-2, rtol=3e-2)
    assert jnp.allclose(w_bf, w_ref, atol=3e-2, rtol=3e-2)

    print("KERNEL_OK")
</pallas_src>

<mosaic_0001>
module attributes {stable_mosaic.version = 11 : i64} {
  func.func @bahdanau_kernel(%arg0: i32, %arg1: memref<2x32xf32, #tpu.memory_space<vmem>>, %arg2: memref<2x8x32xf32, #tpu.memory_space<vmem>>, %arg3: memref<32x32xf32, #tpu.memory_space<vmem>>, %arg4: memref<32x32xf32, #tpu.memory_space<vmem>>, %arg5: memref<1x32xf32, #tpu.memory_space<vmem>>, %arg6: memref<1x32xf32, #tpu.memory_space<vmem>>, %arg7: memref<2x32xf32, #tpu.memory_space<vmem>>, %arg8: memref<2x8xf32, #tpu.memory_space<vmem>>) attributes {dimension_semantics = [#tpu.dimension_semantics<parallel>], iteration_bounds = array<i64: 1>, scalar_prefetch = 0 : i64, scratch_operands = 0 : i64, tpu.core_type = #tpu.core_type<tc>, window_params = [{transform_indices = @transform_0, window_bounds = array<i64: 2, 32>}, {transform_indices = @transform_1, window_bounds = array<i64: 2, 8, 32>}, {pipeline_mode = #tpu.pipeline_mode<synchronous>, transform_indices = @transform_2, window_bounds = array<i64: 32, 32>}, {pipeline_mode = #tpu.pipeline_mode<synchronous>, transform_indices = @transform_3, window_bounds = array<i64: 32, 32>}, {pipeline_mode = #tpu.pipeline_mode<synchronous>, transform_indices = @transform_4, window_bounds = array<i64: 1, 32>}, {pipeline_mode = #tpu.pipeline_mode<synchronous>, transform_indices = @transform_5, window_bounds = array<i64: 1, 32>}, {transform_indices = @transform_6, window_bounds = array<i64: 2, 32>}, {transform_indices = @transform_7, window_bounds = array<i64: 2, 8>}]} {
    %c0 = arith.constant 0 : index
    %c0_0 = arith.constant 0 : index
    %0 = vector.load %arg1[%c0, %c0_0] : memref<2x32xf32, #tpu.memory_space<vmem>>, vector<2x32xf32>
    %c0_1 = arith.constant 0 : index
    %c0_2 = arith.constant 0 : index
    %c0_3 = arith.constant 0 : index
    %1 = vector.load %arg2[%c0_1, %c0_2, %c0_3] : memref<2x8x32xf32, #tpu.memory_space<vmem>>, vector<2x8x32xf32>
    %c0_4 = arith.constant 0 : index
    %c0_5 = arith.constant 0 : index
    %2 = vector.load %arg3[%c0_4, %c0_5] : memref<32x32xf32, #tpu.memory_space<vmem>>, vector<32x32xf32>
    %cst = arith.constant dense<0.000000e+00> : vector<2x32xf32>
    %3 = tpu.matmul %0, %2, %cst {dimension_numbers = #tpu.dot_dimension_numbers<[1], [0], [0], [1], [0, 0, 1, 1], [], []>} : vector<2x32xf32>, vector<32x32xf32>, vector<2x32xf32> -> vector<2x32xf32>
    %c0_6 = arith.constant 0 : index
    %c0_7 = arith.constant 0 : index
    %4 = vector.load %arg5[%c0_6, %c0_7] : memref<1x32xf32, #tpu.memory_space<vmem>>, vector<1x32xf32>
    %5 = vector.broadcast %4 : vector<1x32xf32> to vector<2x32xf32>
    %6 = arith.addf %3, %5 : vector<2x32xf32>
    %7 = vector.shape_cast %1 : vector<2x8x32xf32> to vector<16x32xf32>
    %c0_8 = arith.constant 0 : index
    %c0_9 = arith.constant 0 : index
    %8 = vector.load %arg4[%c0_8, %c0_9] : memref<32x32xf32, #tpu.memory_space<vmem>>, vector<32x32xf32>
    %cst_10 = arith.constant dense<0.000000e+00> : vector<16x32xf32>
    %9 = tpu.matmul %7, %8, %cst_10 {dimension_numbers = #tpu.dot_dimension_numbers<[1], [0], [0], [1], [0, 0, 1, 1], [], []>} : vector<16x32xf32>, vector<32x32xf32>, vector<16x32xf32> -> vector<16x32xf32>
    %10 = vector.shape_cast %9 : vector<16x32xf32> to vector<2x8x32xf32>
    %11 = vector.shape_cast %6 : vector<2x32xf32> to vector<2x1x32xf32>
    %12 = vector.broadcast %11 : vector<2x1x32xf32> to vector<2x8x32xf32>
    %13 = arith.addf %12, %10 : vector<2x8x32xf32>
    %14 = math.tanh %13 : vector<2x8x32xf32>
    %c0_11 = arith.constant 0 : index
    %c0_12 = arith.constant 0 : index
    %15 = vector.load %arg6[%c0_11, %c0_12] : memref<1x32xf32, #tpu.memory_space<vmem>>, vector<1x32xf32>
    %16 = vector.shape_cast %15 : vector<1x32xf32> to vector<1x1x32xf32>
    %17 = vector.broadcast %16 : vector<1x1x32xf32> to vector<2x8x32xf32>
    %18 = arith.mulf %14, %17 : vector<2x8x32xf32>
    %cst_13 = arith.constant dense<0.000000e+00> : vector<2x8xf32>
    %19 = vector.multi_reduction <add>, %18, %cst_13 [2] : vector<2x8x32xf32> to vector<2x8xf32>
    %cst_14 = arith.constant dense<0xFF800000> : vector<2xf32>
    %20 = vector.multi_reduction <maximumf>, %19, %cst_14 [1] : vector<2x8xf32> to vector<2xf32>
    %21 = vector.shape_cast %20 : vector<2xf32> to vector<2x1xf32>
    %22 = vector.broadcast %21 : vector<2x1xf32> to vector<2x8xf32>
    %23 = arith.subf %19, %22 : vector<2x8xf32>
    %24 = math.exp %23 : vector<2x8xf32>
    %cst_15 = arith.constant dense<0.000000e+00> : vector<2xf32>
    %25 = vector.multi_reduction <add>, %24, %cst_15 [1] : vector<2x8xf32> to vector<2xf32>
    %26 = vector.shape_cast %25 : vector<2xf32> to vector<2x1xf32>
    %27 = tpu.reciprocal %26 {approx = true} : vector<2x1xf32> -> vector<2x1xf32>
    %28 = vector.broadcast %27 : vector<2x1xf32> to vector<2x8xf32>
    %29 = arith.mulf %24, %28 : vector<2x8xf32>
    %c0_16 = arith.constant 0 : index
    %c0_17 = arith.constant 0 : index
    %30 = vector.load %arg8[%c0_16, %c0_17] : memref<2x8xf32, #tpu.memory_space<vmem>>, vector<2x8xf32>
    tpu.vector_store %arg8[%c0_16, %c0_17], %29 {strides = array<i32>} : memref<2x8xf32, #tpu.memory_space<vmem>>, vector<2x8xf32>,
    %31 = vector.shape_cast %29 : vector<2x8xf32> to vector<2x8x1xf32>
    %32 = vector.broadcast %31 : vector<2x8x1xf32> to vector<2x8x32xf32>
    %33 = arith.mulf %32, %1 : vector<2x8x32xf32>
    %cst_18 = arith.constant dense<0.000000e+00> : vector<2x32xf32>
    %34 = vector.multi_reduction <add>, %33, %cst_18 [1] : vector<2x8x32xf32> to vector<2x32xf32>
    %c0_19 = arith.constant 0 : index
    %c0_20 = arith.constant 0 : index
    %35 = vector.load %arg7[%c0_19, %c0_20] : memref<2x32xf32, #tpu.memory_space<vmem>>, vector<2x32xf32>
    tpu.vector_store %arg7[%c0_19, %c0_20], %34 {strides = array<i32>} : memref<2x32xf32, #tpu.memory_space<vmem>>, vector<2x32xf32>,
    return
  }
  func.func @transform_0(%arg0: i32) -> (i32, i32) {
    %c0_i32 = arith.constant 0 : i32
    %c0_i32_0 = arith.constant 0 : i32
    return %arg0, %c0_i32 : i32, i32
  }
  func.func @transform_1(%arg0: i32) -> (i32, i32, i32) {
    %c0_i32 = arith.constant 0 : i32
    %c0_i32_0 = arith.constant 0 : i32
    %c0_i32_1 = arith.constant 0 : i32
    return %arg0, %c0_i32, %c0_i32_0 : i32, i32, i32
  }
  func.func @transform_2(%arg0: i32) -> (i32, i32) {
    %c0_i32 = arith.constant 0 : i32
    %c0_i32_0 = arith.constant 0 : i32
    %c0_i32_1 = arith.constant 0 : i32
    return %c0_i32, %c0_i32_0 : i32, i32
  }
  func.func @transform_3(%arg0: i32) -> (i32, i32) {
    %c0_i32 = arith.constant 0 : i32
    %c0_i32_0 = arith.constant 0 : i32
    %c0_i32_1 = arith.constant 0 : i32
    return %c0_i32, %c0_i32_0 : i32, i32
  }
  func.func @transform_4(%arg0: i32) -> (i32, i32) {
    %c0_i32 = arith.constant 0 : i32
    %c0_i32_0 = arith.constant 0 : i32
    %c0_i32_1 = arith.constant 0 : i32
    return %c0_i32, %c0_i32_0 : i32, i32
  }
  func.func @transform_5(%arg0: i32) -> (i32, i32) {
    %c0_i32 = arith.constant 0 : i32
    %c0_i32_0 = arith.constant 0 : i32
    %c0_i32_1 = arith.constant 0 : i32
    return %c0_i32, %c0_i32_0 : i32, i32
  }
  func.func @transform_6(%arg0: i32) -> (i32, i32) {
    %c0_i32 = arith.constant 0 : i32
    %c0_i32_0 = arith.constant 0 : i32
    return %arg0, %c0_i32 : i32, i32
  }
  func.func @transform_7(%arg0: i32) -> (i32, i32) {
    %c0_i32 = arith.constant 0 : i32
    %c0_i32_0 = arith.constant 0 : i32
    return %arg0, %c0_i32 : i32, i32
  }
}

</mosaic_0001>

<bundles_post_ra>
// kernel: tpu_custom_call.1
= control target key start
LH: loop header
LB: loop body
LE: loop exit
PB: predicated region body
PF: predicated region fallthrough
CT: control target
= control target key end

     0   :  { %13 = vsyncpa [#allocation3], 0  ;;  %s577_s0 = inlined_call_operand.hbm [shape: f32[2,32], index: 0, kind: input, shape index: {}]   ;;  %s578_s1 = inlined_call_operand.hbm [shape: f32[2,8,32], index: 1, kind: input, shape index: {}]   ;;  %s579_s2 = inlined_call_operand.hbm [shape: f32[32,32], index: 2, kind: input, shape index: {}]   ;;  %s580_s3 = inlined_call_operand.hbm [shape: f32[32,32], index: 3, kind: input, shape index: {}]   ;;  %s581_s4 = inlined_call_operand.vmem [shape: f32[1,32], index: 4, kind: input, shape index: {}]   ;;  %s582_s5 = inlined_call_operand.vmem [shape: f32[1,32], index: 5, kind: input, shape index: {}]   ;;  %s583_s6 = inlined_call_operand.hbm [shape: f32[2,32], index: 6, kind: output, shape index: {0}]   ;;  %s584_s7 = inlined_call_operand.hbm [shape: f32[2,8], index: 7, kind: output, shape index: {1}]  }
   0x1   :  { %14 = vsyncpa [#allocation6], 0 }
   0x2   :  { %15 = vsyncpa [#allocation9], 0 }
   0x3   :  { %16 = vsyncpa [#allocation4], 0  ;;  %s33_s26 = sshll.u32 %s578_s1, 4  ;;  %s34_s26 = int_to_ptr.hbm [resolvable:$true] %s33_s26 }
   0x4   :  { %17 = vsyncpa [#allocation12], 0  ;;  %s482_s27 = smov [#allocation5]   ;;  %s23_s8 = sshll.u32 %s577_s0, 4  ;;  %s24_s8 = int_to_ptr.hbm [resolvable:$true] %s23_s8 }
   0x5   :  { %s35_s28 = sshll.u32 %s482_s27, 4  ;;  %s483_s9 = smov 128   ;;  %s36_s28 = int_to_ptr.vmem [resolvable:$true] %s35_s28 }
   0x6   :  { %s484_s10 = smov 8   ;;  %s485_s11 = smov [#allocation2]  }
   0x7   :  { %41 = dma.hbm_to_vmem [thread:$0]  %s34_s26, 256, %s36_s28, [#allocation6], %s483_s9, %s483_s9, %s484_s10  }
   0x8   :  { %s25_s12 = sshll.u32 %s485_s11, 4  ;;  %s46_s15 = sshll.u32 %s579_s2, 4  ;;  %s26_s12 = int_to_ptr.vmem [resolvable:$true] %s25_s12  ;;  %s47_s15 = int_to_ptr.hbm [resolvable:$true] %s46_s15 }
   0x9   :  { %28 = dma.hbm_to_vmem [thread:$0]  %s24_s8, 32, %s26_s12, [#allocation3]  }
   0xa   :  { %s59_s17 = sshll.u32 %s580_s3, 4  ;;  %s486_s18 = smov [#allocation7]   ;;  %s60_s17 = int_to_ptr.hbm [resolvable:$true] %s59_s17 }
   0xb   :  { %s48_s19 = sshll.u32 %s486_s18, 4  ;;  %s487_s0 = smov [#allocation8]   ;;  %s49_s19 = int_to_ptr.vmem [resolvable:$true] %s48_s19 }
   0xc   :  { %54 = dma.hbm_to_vmem [thread:$0]  %s47_s15, 512, %s49_s19, [#allocation6], %s483_s9, %s483_s9, %s484_s10  }
   0xd   :  { %s61_s20 = sshll.u32 %s487_s0, 4  ;;  %s62_s20 = int_to_ptr.vmem [resolvable:$true] %s61_s20 }
   0xe   :  { %67 = dma.hbm_to_vmem [thread:$0]  %s60_s17, 512, %s62_s20, [#allocation9], %s483_s9, %s483_s9, %s484_s10  }
   0xf   :  { %472 = dma.done.wait [#allocation3], 32  }
  0x10   :  { %473 = vsyncadd [#allocation3], 4294967264 }
  0x11   :  { %474 = dma.done.wait [#allocation6], 768  }
  0x12   :  { %475 = vsyncadd [#allocation6], 4294966528 }
  0x13   :  { %476 = dma.done.wait [#allocation9], 512  }
  0x14   :  { %477 = vsyncadd [#allocation9], 4294966784  ;;  %v94_v0 = vld [vmem:[#allocation7 + $0x18] sm:$0xff]  ;;  %v93_v2 = vld [vmem:[#allocation7 + $0x10] sm:$0xff]  ;;  %vm99_vm0 = vcmask 261120   ;;  %v180_v29 = vlaneseq  ;;  %vm184_vm1 = vcmask 1041409  }
  0x15   :  { %v126_v1 = vld [vmem:[#allocation8 + $0x18] sm:$0xff]  ;;  %115 = vmatpush.msra.mxu0 %v94_v0  ;;  %v125_v3 = vld [vmem:[#allocation8 + $0x10] sm:$0xff]  ;;  %v92_v4 = vld [vmem:[#allocation7 + $0x8] sm:$0xff]  ;;  %vm187_vm2 = vcmask 58368   ;;  %v488_v36 = vmov 0   ;;  %s280_s25 = sshll.u32 %s584_s7, 4  ;;  %s281_s25 = int_to_ptr.hbm [resolvable:$true] %s280_s25 }
  0x16   :  { %300 = vmatpush.msra.mxu2 %v126_v1  ;;  %145 = vmatpush.msra.mxu1 %v126_v1  ;;  %v124_v5 = vld [vmem:[#allocation8 + $0x8] sm:$0xff]  ;;  %v91_v6 = vld [vmem:[#allocation7] sm:$0xff]  ;;  %v543_v9 = vld [vmem:[#allocation5 + $0x8] sm:$0xff]  ;;  %v181_v30 = vand.u32 127, %v180_v29  ;;  %s490_s7 = smov [#allocation10]   ;;  %s269_s29 = sshll.u32 %s583_s6, 4  ;;  %s270_s29 = int_to_ptr.hbm [resolvable:$true] %s269_s29 }
  0x17   :  { %116 = vmatpush.msra.mxu0 %v93_v2  ;;  %v123_v7 = vld [vmem:[#allocation8] sm:$0xff]  ;;  %v88_v8 = vld [vmem:[#allocation2] sm:$0x3]  ;;  %v545_v10 = vld [vmem:[#allocation5] sm:$0xff]  ;;  %314 = vset.pattern.permute.xlu2 %v488_v36  ;;  %s267_s26 = sshll.u32 %s490_s7, 4  ;;  %vm260_vm3 = vcmask 254976   ;;  %s268_s26 = int_to_ptr.vmem [resolvable:$true] %s267_s26 }
  0x18   :  { %301 = vmatpush.msra.mxu2 %v125_v3  ;;  %146 = vmatpush.msra.mxu1 %v125_v3  ;;  %v316_v11 = vld [vmem:[%s581_s4] ss:$0 sm:$0xff]  ;;  %s489_s4 = smov [#allocation11]  }
  0x19   :  { %117 = vmatpush.msra.mxu0 %v92_v4  ;;  %v317_v21 = vld [vmem:[%s582_s5] ss:$0 sm:$0xff]  ;;  %313 = vset.pattern.permute.xlu1 %v488_v36  ;;  %s278_s5 = sshll.u32 %s489_s4, 4  ;;  %s279_s5 = int_to_ptr.vmem [resolvable:$true] %s278_s5 }
  0x1a   :  { %302 = vmatpush.msra.mxu2 %v124_v5  ;;  %147 = vmatpush.msra.mxu1 %v124_v5 }
  0x1b   :  { %118 = vmatpush.msra.mxu0 %v91_v6  ;;  %315 = vset.pattern.permute.xlu0 %v488_v36 }
  0x1c   :  { %303 = vmatpush.msra.mxu2 %v123_v7  ;;  %297 = vmatmul.msk.f32.vlgmr.msra.gmra.mxu0 %vm99_vm0, %v88_v8 }
  0x1d   :  { %299 = vmatmul.msk.f32.vlgmr.msra.gmra.mxu2 %vm99_vm0, %v543_v9  ;;  %148 = vmatpush.msra.mxu1 %v123_v7 }
  0x1e   :  { %298 = vmatmul.msk.f32.vlgmr.msra.gmra.mxu1 %vm99_vm0, %v545_v10 }
  0x99   :  { %v120_v12 = vpop.f32.mrf.mxu0 }
  0x9a   :  { %v121_v13 = vadd.f32 %v316_v11, %v120_v12 }
  0x9b   :  { %v150_v14 = vpop.f32.mrf.mxu1 }
  0x9c   :  { %v157_v15 = vrot.slane %v121_v13, 1  ;;  %v158_v16 = vperm.slane %v121_v13, 0 }
  0x9e   :  { %v162_v17 = vadd.f32 %v158_v16, %v150_v14  ;;  %v159_v18 = vperm.slane %v157_v15, 0 }
  0xa0   :  { %v153_v19 = vpop.f32.mrf.mxu2  ;;  %318 = vtanh.f32 %v162_v17 }
  0xa1   :  { %v163_v20 = vadd.f32 %v159_v18, %v153_v19 }
  0xa3   :  { %320 = vtanh.f32 %v163_v20 }
  0xa6   :  { %v319_v22 = vpop.eup %318 }
  0xa7   :  { %v170_v23 = vmul.f32 %v319_v22, %v317_v21 }
  0xa9   :  { %v172_v24 = vsel %vm99_vm0, %v170_v23, 0.0  ;;  %v321_v25 = vpop.eup %320 }
  0xaa   :  { %173 = vadd.xlane.f32.xlu0 %v172_v24  ;;  %v171_v26 = vmul.f32 %v321_v25, %v317_v21 }
  0xac   :  { %v175_v27 = vsel %vm99_vm0, %v171_v26, 0.0 }
  0xb2   :  { %176 = vadd.xlane.f32.xlu0 %v175_v27 }
 0x11d   :  { %v174_v28 = vpop.xlane.xlu0 %173 }
 0x11e   :  { %v182_v32 = vperm.slane %v174_v28, %v181_v30 }
 0x125   :  { %v177_v31 = vpop.xlane.xlu0 %176 }
 0x126   :  { %v183_v33 = vperm.slane %v177_v31, %v181_v30 }
 0x128   :  { %v185_v34 = vsel %vm184_vm1, %v183_v33, %v182_v32 }
 0x129   :  { %v188_v35 = vsel %vm187_vm2, %v185_v34, -inf }
 0x12a   :  { %189 = vmax.xlane.f32.xlu1 %v188_v35 }
 0x19d   :  { %v190_v37 = vpop.xlane.xlu1 %189 }
 0x19e   :  { %v192_v38 = vperm.slane %v190_v37, 0  ;;  %v193_v39 = vperm.slane %v190_v37, 1 }
 0x1a0   :  { %v196_v40 = vsub.f32 %v174_v28, %v192_v38  ;;  %v197_v41 = vsub.f32 %v177_v31, %v193_v39 }
 0x1a2   :  { %v198_v42 = vmul.f32 1.442695, %v196_v40  ;;  %v200_v43 = vmul.f32 1.442695, %v197_v41 }
 0x1a4   :  { %322 = vpow2.f32 %v198_v42 }
 0x1a5   :  { %324 = vpow2.f32 %v200_v43 }
 0x1aa   :  { %v323_v44 = vpop.eup %322 }
 0x1ab   :  { %v325_v45 = vpop.eup %324  ;;  %205 = vperm.xlu1 %313, %v323_v44  }
 0x1ac   :  { %208 = vperm.xlu2 %314, %v325_v45  }
 0x206   :  { %v209_v46 = vpop.permute.xlu2 %208 }
 0x207   :  { %v211_v48 = vperm.slane %v209_v46, %v181_v30 }
 0x21d   :  { %v206_v47 = vpop.permute.xlu1 %205 }
 0x21e   :  { %v210_v49 = vperm.slane %v206_v47, %v181_v30 }
 0x220   :  { %v212_v50 = vsel %vm184_vm1, %v211_v48, %v210_v49 }
 0x221   :  { %v214_v51 = vsel %vm187_vm2, %v212_v50, 0.0 }
 0x222   :  { %215 = vadd.xlane.f32.xlu2 %v214_v51 }
 0x295   :  { %v216_v52 = vpop.xlane.xlu2 %215 }
 0x296   :  { %326 = vrcp.f32 %v216_v52 }
 0x29c   :  { %v327_v53 = vpop.eup %326 }
 0x29d   :  { %v220_v54 = vperm.slane %v327_v53, 1  ;;  %v219_v55 = vperm.slane %v327_v53, 0 }
 0x29f   :  { %v224_v56 = vmul.f32 %v325_v45, %v220_v54  ;;  %v223_v57 = vmul.f32 %v323_v44, %v219_v55 }
 0x2a1   :  { %231 = vperm.xlu1 %313, %v224_v56   ;;  %228 = vperm.xlu0 %315, %v223_v57  }
 0x313   :  { %v232_v58 = vpop.permute.xlu1 %231  ;;  %v229_v59 = vpop.permute.xlu0 %228 }
 0x314   :  { %v234_v60 = vperm.slane %v232_v58, %v181_v30  ;;  %v241_v61 = vmul.f32 %v232_v58, %v543_v9  ;;  %v233_v62 = vperm.slane %v229_v59, %v181_v30  ;;  %v240_v63 = vmul.f32 %v229_v59, %v545_v10 }
 0x316   :  { %v249_v0 = vsel %vm99_vm0, %v241_v61, 0.0  ;;  %v235_v1 = vsel %vm184_vm1, %v234_v60, %v233_v62  ;;  %v242_v2 = vsel %vm99_vm0, %v240_v63, 0.0 }
 0x317   :  { %v250_v3 = vrot.slane %v249_v0, 4  ;;  %v243_v4 = vrot.slane %v242_v2, 4  ;;  %237 = vst.msk [vmem:[#allocation11] sm:$0x3] %vm187_vm2, %v235_v1 }
 0x318   :  { %283 = dma.vmem_to_hbm [thread:$0]  %s279_s5, 32, %s281_s25, [#allocation12]  }
 0x319   :  { %v251_v5 = vadd.f32 %v250_v3, %v249_v0  ;;  %v244_v6 = vadd.f32 %v243_v4, %v242_v2 }
 0x31b   :  { %v252_v7 = vrot.slane %v251_v5, 2  ;;  %v245_v8 = vrot.slane %v244_v6, 2 }
 0x31d   :  { %v253_v9 = vadd.f32 %v252_v7, %v251_v5  ;;  %v246_v11 = vadd.f32 %v245_v8, %v244_v6 }
 0x31f   :  { %v254_v10 = vrot.slane %v253_v9, 1  ;;  %v247_v12 = vrot.slane %v246_v11, 1 }
 0x321   :  { %v255_v13 = vadd.f32 %v254_v10, %v253_v9  ;;  %v248_v14 = vadd.f32 %v247_v12, %v246_v11 }
 0x323   :  { %v258_v15 = vsel %vm184_vm1, %v255_v13, %v248_v14 }
 0x324   :  { %261 = vst.msk [vmem:[#allocation10] sm:$0x3] %vm260_vm3, %v258_v15 }
 0x325   :  { %272 = dma.vmem_to_hbm [thread:$0]  %s268_s26, 32, %s270_s29, [#allocation4]  }
 0x326   :  { %478 = dma.done.wait [#allocation4], 32  }
 0x327   :  { %479 = vsyncadd [#allocation4], 4294967264 }
 0x328   :  { %480 = dma.done.wait [#allocation12], 32  }
 0x329   :  { %481 = vsyncadd [#allocation12], 4294967264 }
 0x32a   :  { %292 = vsyncpa [#allocation3], 1 }
 0x32b   :  { %293 = vsyncpa [#allocation6], 1 }
 0x32c   :  { %294 = vsyncpa [#allocation9], 1 }
 0x32d   :  { %295 = vsyncpa [#allocation4], 1 }
 0x32e   :  { %296 = vsyncpa [#allocation12], 1 }

</bundles_post_ra>
